<compile_context>
chip_gen: v7x
topology: tpu7x:2x2x1
jax: 0.10.0
libtpu: 0.0.40
codegen_flags: <defaults>
</compile_context>

<pallas_src>
import functools

import jax
import jax.numpy as jnp
from jax import lax
from jax.experimental import pallas as pl
from jax.experimental.pallas import tpu as pltpu

# MXU operand dtype: bf16 inputs + f32 accumulation. Set to jnp.float32 to
# recover pure-f32 matmul semantics.
MXU_DTYPE = jnp.bfloat16

# Lane-dense output width (kernel writes this many lanes; wrapper slices :2).
OUT_LANES = 128


def _mxu_dot(a, b):
    return jnp.dot(a.astype(MXU_DTYPE), b.astype(MXU_DTYPE),
                   preferred_element_type=jnp.float32)


def _mxu_einsum(eq, a, b):
    return jnp.einsum(eq, a.astype(MXU_DTYPE), b.astype(MXU_DTYPE),
                      preferred_element_type=jnp.float32)


# ---------------------------------------------------------------------------
# Fused kernel: full forward for one batch block, everything resident in VMEM.
# ---------------------------------------------------------------------------
def _fused_deepset_kernel(*refs, piece_counts, n_clf, out_lanes):
    """refs = [inp,
               per layer: w1cat x pieces, b1cat, w2blk, b2cat,
               wqkv_x, wqkv_i, bqkv, wo, bo,
               per classifier layer: (w, b),
               out]"""
    it = iter(refs)
    inp_ref = next(it)
    layer_refs = []
    for npc in piece_counts:
        w1c = [next(it) for _ in range(npc)]
        b1 = next(it)
        w2 = next(it)
        b2 = next(it)
        layer_refs.append((w1c, b1, w2, b2))
    wqx_ref = next(it)
    wqi_ref = next(it)
    bqkv_ref = next(it)
    wo_ref = next(it)
    bo_ref = next(it)
    clf_refs = [(next(it), next(it)) for _ in range(n_clf)]
    out_ref = next(it)

    inp = inp_ref[...]                                    # (Bb, N, F) f32
    Bb, N, F = inp.shape
    inv_n = 1.0 / float(N)
    # inp feeds every layer and the qkv projection: cast to bf16 exactly once.
    inp_bf = inp.reshape(Bb * N, F).astype(MXU_DTYPE)

    # ----------------------------- DeepSet layers -----------------------------
    x = None
    for li, (w1c_refs, b1_ref, w2_ref, b2_ref) in enumerate(layer_refs):
        # torch.cat((inp, relu(prev)), dim=2) folded into per-piece row-split
        # matmuls against the column-packed [W1a | W1b].
        pieces = [inp_bf]
        if li > 0:
            pieces.append(jnp.maximum(x, 0.0)
                          .reshape(Bb * N, x.shape[-1]).astype(MXU_DTYPE))
        acc = None                                        # x_cat @ [W1a | W1b]
        for p_bf, wc_ref in zip(pieces, w1c_refs):
            t = _mxu_dot(p_bf, wc_ref[...])
            acc = t if acc is None else acc + t
        two_mid = acc.shape[-1]
        mid = two_mid // 2
        acc3 = acc.reshape(Bb, N, two_mid)
        # Branch b sees (x - mean_N(x)); the mean commutes with the linear map,
        # so the correction is just the set-mean of the branch-b half of the
        # f32 accumulator (cheap sublane reduce, no extra MXU work/weights).
        corr = jnp.sum(acc3, axis=1) * inv_n              # (Bb, 2*mid) f32
        lane = lax.broadcasted_iota(jnp.int32, corr.shape, 1)
        corr = jnp.where(lane >= mid, corr, 0.0)          # zero the branch-a half
        h = acc3 + (b1_ref[...] - corr)[:, None, :]
        h = jnp.maximum(h, 0.0).reshape(Bb * N, two_mid)
        y2 = jnp.tanh(_mxu_dot(h, w2_ref[...]) + b2_ref[...])     # (Bb*N, 2*out)
        out_f = y2.shape[-1] // 2
        y = y2[:, :out_f] + y2[:, out_f:]                 # tanh(branch a)+tanh(branch b)
        # channel fro-norm via rsqrt (EUP) instead of a divide (VALU).
        # Note: exactly-zero rows give NaN, matching torch.norm semantics.
        y = y * lax.rsqrt(jnp.sum(y * y, axis=-1, keepdims=True))
        x = y.reshape(Bb, N, out_f)

    # ---------------- single-head attention over the set + set-sum ------------
    E = x.shape[-1]
    x_bf = x.reshape(Bb * N, E).astype(MXU_DTYPE)
    # 1/sqrt(E) is pre-folded into the q columns of wqkv_x/wqkv_i/bqkv.
    qkv = (_mxu_dot(x_bf, wqx_ref[...]) +
           _mxu_dot(inp_bf, wqi_ref[...]) +
           bqkv_ref[...]).reshape(Bb, N, 3 * E)
    q = qkv[:, :, :E]
    k = qkv[:, :, E:2 * E]
    v = qkv[:, :, 2 * E:]
    logits = _mxu_einsum('bnd,bmd->bnm', q, k)
    m = jnp.max(logits, axis=-1, keepdims=True)
    p = jnp.exp(logits - m)
    attn = p * pl.reciprocal(jnp.sum(p, axis=-1, keepdims=True), approx=True)
    vals = _mxu_einsum('bnm,bmd->bnd', attn, v)           # (Bb, N, E)
    # set-sum commutes with the output projection (affine):
    h = _mxu_dot(jnp.sum(vals, axis=1), wo_ref[...]) + float(N) * bo_ref[...]

    # -------------------------- classifier + softmax --------------------------
    for ci, (w_ref, b_ref) in enumerate(clf_refs):
        h = _mxu_dot(h, w_ref[...]) + b_ref[...]
        if ci < n_clf - 1:
            h = jnp.maximum(h, 0.0)
    m = jnp.max(h, axis=-1, keepdims=True)
    p = jnp.exp(h - m)
    probs = p / jnp.sum(p, axis=-1, keepdims=True)        # exact on the output
    # Lane-dense store: pad the 2-wide probabilities to the full lane width.
    pad = jnp.zeros((Bb, out_lanes - probs.shape[-1]), jnp.float32)
    out_ref[...] = jnp.concatenate([probs, pad], axis=-1)


# ---------------------------------------------------------------------------
# One-time weight prep (offline, NOT per-forward).
# ---------------------------------------------------------------------------
def _block_diag(a, b):
    ra, ca = a.shape
    rb, cb = b.shape
    return jnp.concatenate(
        [jnp.concatenate([a, jnp.zeros((ra, cb), a.dtype)], axis=1),
         jnp.concatenate([jnp.zeros((rb, ca), b.dtype), b], axis=1)], axis=0)


def fuse_params(params, in_features):
    """Split W1 rows into [inp | prev] pieces, merge branch a/b column-wise
    ([W1a|W1b]) and block-diagonally (W2), fold the 1/sqrt(E) attention scale
    into the q columns of the qkv projection, and cast matmul weights to the
    MXU operand dtype (biases stay f32)."""
    def mx(w):
        return w.astype(MXU_DTYPE)

    args, piece_counts = [], []
    for li, lp in enumerate(params['layers']):
        w1a, w1b = lp['w1a'], lp['w1b']                   # (cin, mid)
        cin, mid = w1a.shape
        splits = [(0, cin)] if li == 0 else [(0, in_features), (in_features, cin)]
        piece_counts.append(len(splits))
        w1c = [mx(jnp.concatenate([w1a[lo:hi], w1b[lo:hi]], axis=1))
               for lo, hi in splits]
        args += w1c
        args += [jnp.concatenate([lp['b1a'], lp['b1b']], axis=-1),
                 mx(_block_diag(lp['w2a'], lp['w2b'])),
                 jnp.concatenate([lp['b2a'], lp['b2b']], axis=-1)]
    a = params['attn']
    E = a['wo'].shape[0]
    scale = 1.0 / float(E) ** 0.5

    def scale_q(w):                                       # fold 1/sqrt(E) into q
        return jnp.concatenate([w[:, :E] * scale, w[:, E:]], axis=1)

    args += [mx(scale_q(a['wqkv_x'])), mx(scale_q(a['wqkv_i'])),
             scale_q(a['bqkv']), mx(a['wo']), a['bo']]
    for lp in params['clf']:
        args += [mx(lp['w']), lp['b']]
    return tuple(args), tuple(piece_counts), len(params['clf'])


def _choose_block_b(B, N):
    if B <= 8:
        return B
    # >= 512 matmul rows (Bb*N) per grid step to fill the MXU, multiple-of-8
    # batch blocks, but keep the grid length >= 2 so the 'parallel' batch axis
    # shards across v7x's two TensorCores.  At these channel widths the live
    # f32 intermediates are a few hundred KiB per block -> far under the v7x
    # 64 MiB VMEM, so no explicit vmem_limit_bytes is needed.
    bb = max(8, pl.cdiv(512, N))
    bb = min(bb, max(8, pl.cdiv(B, 2)))
    bb = ((bb + 7) // 8) * 8
    return min(bb, B)


def deepset_forward(inp, fused):
    weights, piece_counts, n_clf = fused
    B, N, F = inp.shape
    block_b = _choose_block_b(B, N)
    grid = (pl.cdiv(B, block_b),)

    in_specs = [pl.BlockSpec((block_b, N, F), lambda i: (i, 0, 0))]
    in_specs += [pl.BlockSpec(w.shape, lambda i: (0, 0)) for w in weights]  # resident
    out_spec = pl.BlockSpec((block_b, OUT_LANES), lambda i: (i, 0))

    kernel = functools.partial(_fused_deepset_kernel,
                               piece_counts=piece_counts, n_clf=n_clf,
                               out_lanes=OUT_LANES)
    out = pl.pallas_call(
        kernel,
        out_shape=jax.ShapeDtypeStruct((B, OUT_LANES), jnp.float32),
        grid=grid,
        in_specs=in_specs,
        out_specs=out_spec,
        compiler_params=pltpu.CompilerParams(
            dimension_semantics=("parallel",)),
    )(inp, *weights)
    return out[:, :2]


# ---------------------------------------------------------------------------
# Deterministic synthetic parameters (shapes follow the nn.Module __init__).
# ---------------------------------------------------------------------------
def init_params(key, in_features, feats, classifier_layers):
    state = {'key': key}

    def nxt():
        state['key'], sub = jax.random.split(state['key'])
        return sub

    def w(shape):
        return jax.random.normal(nxt(), shape, jnp.float32) / jnp.sqrt(float(shape[0]))

    def b(n):
        return 0.01 * jax.random.normal(nxt(), (1, n), jnp.float32)

    params = {'layers': [], 'attn': {}, 'clf': []}
    prev = [0] + list(feats[:-1])
    for i, out_f in enumerate(feats):
        cin = in_features + prev[i]
        mid = int((in_features + prev[i] + out_f) / 2)
        params['layers'].append(dict(
            w1a=w((cin, mid)), b1a=b(mid), w2a=w((mid, out_f)), b2a=b(out_f),
            w1b=w((cin, mid)), b1b=b(mid), w2b=w((mid, out_f)), b2b=b(out_f)))

    E = feats[-1]
    wqkv = w((E + in_features, 3 * E))                    # rows [x ; inp] (concat order)
    params['attn'] = dict(
        wqkv_x=wqkv[:E], wqkv_i=wqkv[E:],
        bqkv=jnp.zeros((1, 3 * E), jnp.float32),          # qkv bias filled with 0
        wo=w((E, E)), bo=jnp.zeros((1, E), jnp.float32))

    dims = [E] + list(classifier_layers) + [2]
    for i in range(len(dims) - 1):
        params['clf'].append(dict(w=w((dims[i], dims[i + 1])), b=b(dims[i + 1])))
    return params


# ---------------------------------------------------------------------------
# Pure-JAX reference, faithful to the nn.Module structure.  dot_dtype controls
# the matmul operand precision so the kernel's bf16-operand MXU dots can be
# checked tightly (f32 accumulation in both cases).
# ---------------------------------------------------------------------------
def deepset_forward_ref(inp, params, dot_dtype=jnp.float32):
    def dot(a, b):
        return jnp.dot(a.astype(dot_dtype), b.astype(dot_dtype),
                       preferred_element_type=jnp.float32)

    def bdot(eq, a, b):
        return jnp.einsum(eq, a.astype(dot_dtype), b.astype(dot_dtype),
                          preferred_element_type=jnp.float32)

    def layer_ref(x, p):
        mean = jnp.mean(x, axis=1, keepdims=True)

        def branch(z, w1, b1, w2, b2):
            h = jnp.maximum(dot(z, w1) + b1, 0.0)
            return jnp.tanh(dot(h, w2) + b2)

        y = (branch(x, p['w1a'], p['b1a'], p['w2a'], p['b2a']) +
             branch(x - mean, p['w1b'], p['b1b'], p['w2b'], p['b2b']))
        return y / jnp.sqrt(jnp.sum(y * y, axis=-1, keepdims=True))

    x = inp
    n = len(params['layers'])
    for i, lp in enumerate(params['layers']):
        x = layer_ref(x, lp)
        if i < n - 1:
            x = jnp.concatenate([inp, jnp.maximum(x, 0.0)], axis=2)

    a = params['attn']
    E = x.shape[-1]
    qkv = dot(x, a['wqkv_x']) + dot(inp, a['wqkv_i']) + a['bqkv']
    q, k, v = qkv[..., :E], qkv[..., E:2 * E], qkv[..., 2 * E:]
    logits = bdot('bnd,bmd->bnm', q, k) / jnp.sqrt(jnp.float32(E))
    attn = jax.nn.softmax(logits, axis=-1)
    vals = bdot('bnm,bmd->bnd', attn, v)
    o = dot(vals, a['wo']) + a['bo']
    h = jnp.sum(o, axis=1)

    for li, lp in enumerate(params['clf']):
        h = dot(h, lp['w']) + lp['b']
        if li < len(params['clf']) - 1:
            h = jnp.maximum(h, 0.0)
    return jax.nn.softmax(h, axis=-1)


if __name__ == "__main__":
    in_features = 6
    feats = [16, 16]
    classifier_layers = [32, 16]
    B, N = 2, 8

    params = init_params(jax.random.PRNGKey(42), in_features, feats, classifier_layers)
    inp = jax.random.normal(jax.random.PRNGKey(0), (B, N, in_features), jnp.float32)

    fused = fuse_params(params, in_features)               # one-time weight prep
    out = jax.block_until_ready(deepset_forward(inp, fused))
    assert out.shape == (B, 2), out.shape

    # Tight check: same math at the same MXU operand precision (bf16-in, f32-acc).
    ref_mx = deepset_forward_ref(inp, params, dot_dtype=MXU_DTYPE)
    assert bool(jnp.allclose(out, ref_mx, atol=2e-2, rtol=5e-2)), (out, ref_mx)

    # Loose structural check against the full-f32 reference (bf16 MXU operands
    # vs f32 matmuls).
    ref_f32 = deepset_forward_ref(inp, params, dot_dtype=jnp.float32)
    assert bool(jnp.allclose(out, ref_f32, atol=5e-2, rtol=2e-1)), (out, ref_f32)

    print("KERNEL_OK")
</pallas_src>

<mosaic_0001>
module attributes {stable_mosaic.version = 11 : i64} {
  func.func @_fused_deepset_kernel(%arg0: i32, %arg1: memref<2x8x6xf32, #tpu.memory_space<vmem>>, %arg2: memref<6x22xbf16, #tpu.memory_space<vmem>>, %arg3: memref<1x22xf32, #tpu.memory_space<vmem>>, %arg4: memref<22x32xbf16, #tpu.memory_space<vmem>>, %arg5: memref<1x32xf32, #tpu.memory_space<vmem>>, %arg6: memref<6x38xbf16, #tpu.memory_space<vmem>>, %arg7: memref<16x38xbf16, #tpu.memory_space<vmem>>, %arg8: memref<1x38xf32, #tpu.memory_space<vmem>>, %arg9: memref<38x32xbf16, #tpu.memory_space<vmem>>, %arg10: memref<1x32xf32, #tpu.memory_space<vmem>>, %arg11: memref<16x48xbf16, #tpu.memory_space<vmem>>, %arg12: memref<6x48xbf16, #tpu.memory_space<vmem>>, %arg13: memref<1x48xf32, #tpu.memory_space<vmem>>, %arg14: memref<16x16xbf16, #tpu.memory_space<vmem>>, %arg15: memref<1x16xf32, #tpu.memory_space<vmem>>, %arg16: memref<16x32xbf16, #tpu.memory_space<vmem>>, %arg17: memref<1x32xf32, #tpu.memory_space<vmem>>, %arg18: memref<32x16xbf16, #tpu.memory_space<vmem>>, %arg19: memref<1x16xf32, #tpu.memory_space<vmem>>, %arg20: memref<16x2xbf16, #tpu.memory_space<vmem>>, %arg21: memref<1x2xf32, #tpu.memory_space<vmem>>, %arg22: memref<2x128xf32, #tpu.memory_space<vmem>>) attributes {dimension_semantics = [#tpu.dimension_semantics<parallel>], iteration_bounds = array<i64: 1>, scalar_prefetch = 0 : i64, scratch_operands = 0 : i64, tpu.core_type = #tpu.core_type<tc>, window_params = [{transform_indices = @transform_0, window_bounds = array<i64: 2, 8, 6>}, {pipeline_mode = #tpu.pipeline_mode<synchronous>, transform_indices = @transform_1, window_bounds = array<i64: 6, 22>}, {pipeline_mode = #tpu.pipeline_mode<synchronous>, transform_indices = @transform_2, window_bounds = array<i64: 1, 22>}, {pipeline_mode = #tpu.pipeline_mode<synchronous>, transform_indices = @transform_3, window_bounds = array<i64: 22, 32>}, {pipeline_mode = #tpu.pipeline_mode<synchronous>, transform_indices = @transform_4, window_bounds = array<i64: 1, 32>}, {pipeline_mode = #tpu.pipeline_mode<synchronous>, transform_indices = @transform_5, window_bounds = array<i64: 6, 38>}, {pipeline_mode = #tpu.pipeline_mode<synchronous>, transform_indices = @transform_6, window_bounds = array<i64: 16, 38>}, {pipeline_mode = #tpu.pipeline_mode<synchronous>, transform_indices = @transform_7, window_bounds = array<i64: 1, 38>}, {pipeline_mode = #tpu.pipeline_mode<synchronous>, transform_indices = @transform_8, window_bounds = array<i64: 38, 32>}, {pipeline_mode = #tpu.pipeline_mode<synchronous>, transform_indices = @transform_9, window_bounds = array<i64: 1, 32>}, {pipeline_mode = #tpu.pipeline_mode<synchronous>, transform_indices = @transform_10, window_bounds = array<i64: 16, 48>}, {pipeline_mode = #tpu.pipeline_mode<synchronous>, transform_indices = @transform_11, window_bounds = array<i64: 6, 48>}, {pipeline_mode = #tpu.pipeline_mode<synchronous>, transform_indices = @transform_12, window_bounds = array<i64: 1, 48>}, {pipeline_mode = #tpu.pipeline_mode<synchronous>, transform_indices = @transform_13, window_bounds = array<i64: 16, 16>}, {pipeline_mode = #tpu.pipeline_mode<synchronous>, transform_indices = @transform_14, window_bounds = array<i64: 1, 16>}, {pipeline_mode = #tpu.pipeline_mode<synchronous>, transform_indices = @transform_15, window_bounds = array<i64: 16, 32>}, {pipeline_mode = #tpu.pipeline_mode<synchronous>, transform_indices = @transform_16, window_bounds = array<i64: 1, 32>}, {pipeline_mode = #tpu.pipeline_mode<synchronous>, transform_indices = @transform_17, window_bounds = array<i64: 32, 16>}, {pipeline_mode = #tpu.pipeline_mode<synchronous>, transform_indices = @transform_18, window_bounds = array<i64: 1, 16>}, {pipeline_mode = #tpu.pipeline_mode<synchronous>, transform_indices = @transform_19, window_bounds = array<i64: 16, 2>}, {pipeline_mode = #tpu.pipeline_mode<synchronous>, transform_indices = @transform_20, window_bounds = array<i64: 1, 2>}, {transform_indices = @transform_21, window_bounds = array<i64: 2, 128>}]} {
    %c0 = arith.constant 0 : index
    %c0_0 = arith.constant 0 : index
    %c0_1 = arith.constant 0 : index
    %0 = vector.load %arg1[%c0, %c0_0, %c0_1] : memref<2x8x6xf32, #tpu.memory_space<vmem>>, vector<2x8x6xf32>
    %1 = vector.shape_cast %0 : vector<2x8x6xf32> to vector<16x6xf32>
    %2 = arith.truncf %1 : vector<16x6xf32> to vector<16x6xbf16>
    %c0_2 = arith.constant 0 : index
    %c0_3 = arith.constant 0 : index
    %3 = vector.load %arg2[%c0_2, %c0_3] : memref<6x22xbf16, #tpu.memory_space<vmem>>, vector<6x22xbf16>
    %cst = arith.constant dense<0.000000e+00> : vector<16x22xf32>
    %4 = tpu.matmul %2, %3, %cst {dimension_numbers = #tpu.dot_dimension_numbers<[1], [0], [0], [1], [0, 0, 1, 1], [], []>} : vector<16x6xbf16>, vector<6x22xbf16>, vector<16x22xf32> -> vector<16x22xf32>
    %5 = vector.shape_cast %4 : vector<16x22xf32> to vector<2x8x22xf32>
    %cst_4 = arith.constant dense<0.000000e+00> : vector<2x22xf32>
    %6 = vector.multi_reduction <add>, %5, %cst_4 [1] : vector<2x8x22xf32> to vector<2x22xf32>
    %cst_5 = arith.constant 1.250000e-01 : f32
    %7 = vector.broadcast %cst_5 : f32 to vector<2x22xf32>
    %8 = arith.mulf %6, %7 : vector<2x22xf32>
    %9 = tpu.iota {dimensions = array<i32: 1>} : vector<2x22xi32>
    %c11_i32 = arith.constant 11 : i32
    %10 = vector.broadcast %c11_i32 : i32 to vector<2x22xi32>
    %11 = arith.cmpi sge, %9, %10 : vector<2x22xi32>
    %cst_6 = arith.constant 0.000000e+00 : f32
    %12 = vector.broadcast %cst_6 : f32 to vector<2x22xf32>
    %13 = arith.select %11, %8, %12 : vector<2x22xi1>, vector<2x22xf32>
    %c0_7 = arith.constant 0 : index
    %c0_8 = arith.constant 0 : index
    %14 = vector.load %arg3[%c0_7, %c0_8] : memref<1x22xf32, #tpu.memory_space<vmem>>, vector<1x22xf32>
    %15 = vector.broadcast %14 : vector<1x22xf32> to vector<2x22xf32>
    %16 = arith.subf %15, %13 : vector<2x22xf32>
    %17 = vector.shape_cast %16 : vector<2x22xf32> to vector<2x1x22xf32>
    %18 = vector.broadcast %17 : vector<2x1x22xf32> to vector<2x8x22xf32>
    %19 = arith.addf %5, %18 : vector<2x8x22xf32>
    %cst_9 = arith.constant 0.000000e+00 : f32
    %20 = vector.broadcast %cst_9 : f32 to vector<2x8x22xf32>
    %21 = arith.maximumf %19, %20 : vector<2x8x22xf32>
    %22 = vector.shape_cast %21 : vector<2x8x22xf32> to vector<16x22xf32>
    %c0_10 = arith.constant 0 : index
    %c0_11 = arith.constant 0 : index
    %23 = vector.load %arg4[%c0_10, %c0_11] : memref<22x32xbf16, #tpu.memory_space<vmem>>, vector<22x32xbf16>
    %24 = arith.truncf %22 : vector<16x22xf32> to vector<16x22xbf16>
    %cst_12 = arith.constant dense<0.000000e+00> : vector<16x32xf32>
    %25 = tpu.matmul %24, %23, %cst_12 {dimension_numbers = #tpu.dot_dimension_numbers<[1], [0], [0], [1], [0, 0, 1, 1], [], []>} : vector<16x22xbf16>, vector<22x32xbf16>, vector<16x32xf32> -> vector<16x32xf32>
    %c0_13 = arith.constant 0 : index
    %c0_14 = arith.constant 0 : index
    %26 = vector.load %arg5[%c0_13, %c0_14] : memref<1x32xf32, #tpu.memory_space<vmem>>, vector<1x32xf32>
    %27 = vector.broadcast %26 : vector<1x32xf32> to vector<16x32xf32>
    %28 = arith.addf %25, %27 : vector<16x32xf32>
    %29 = math.tanh %28 : vector<16x32xf32>
    %30 = vector.extract_strided_slice %29 {offsets = [0, 0], sizes = [16, 16], strides = [1, 1]} : vector<16x32xf32> to vector<16x16xf32>
    %31 = vector.extract_strided_slice %29 {offsets = [0, 16], sizes = [16, 16], strides = [1, 1]} : vector<16x32xf32> to vector<16x16xf32>
    %32 = arith.addf %30, %31 : vector<16x16xf32>
    %33 = arith.mulf %32, %32 : vector<16x16xf32>
    %cst_15 = arith.constant dense<0.000000e+00> : vector<16xf32>
    %34 = vector.multi_reduction <add>, %33, %cst_15 [1] : vector<16x16xf32> to vector<16xf32>
    %35 = vector.shape_cast %34 : vector<16xf32> to vector<16x1xf32>
    %36 = math.rsqrt %35 : vector<16x1xf32>
    %37 = vector.broadcast %36 : vector<16x1xf32> to vector<16x16xf32>
    %38 = arith.mulf %32, %37 : vector<16x16xf32>
    %39 = vector.shape_cast %38 : vector<16x16xf32> to vector<2x8x16xf32>
    %cst_16 = arith.constant 0.000000e+00 : f32
    %40 = vector.broadcast %cst_16 : f32 to vector<2x8x16xf32>
    %41 = arith.maximumf %39, %40 : vector<2x8x16xf32>
    %42 = vector.shape_cast %41 : vector<2x8x16xf32> to vector<16x16xf32>
    %43 = arith.truncf %42 : vector<16x16xf32> to vector<16x16xbf16>
    %c0_17 = arith.constant 0 : index
    %c0_18 = arith.constant 0 : index
    %44 = vector.load %arg6[%c0_17, %c0_18] : memref<6x38xbf16, #tpu.memory_space<vmem>>, vector<6x38xbf16>
    %cst_19 = arith.constant dense<0.000000e+00> : vector<16x38xf32>
    %45 = tpu.matmul %2, %44, %cst_19 {dimension_numbers = #tpu.dot_dimension_numbers<[1], [0], [0], [1], [0, 0, 1, 1], [], []>} : vector<16x6xbf16>, vector<6x38xbf16>, vector<16x38xf32> -> vector<16x38xf32>
    %c0_20 = arith.constant 0 : index
    %c0_21 = arith.constant 0 : index
    %46 = vector.load %arg7[%c0_20, %c0_21] : memref<16x38xbf16, #tpu.memory_space<vmem>>, vector<16x38xbf16>
    %cst_22 = arith.constant dense<0.000000e+00> : vector<16x38xf32>
    %47 = tpu.matmul %43, %46, %cst_22 {dimension_numbers = #tpu.dot_dimension_numbers<[1], [0], [0], [1], [0, 0, 1, 1], [], []>} : vector<16x16xbf16>, vector<16x38xbf16>, vector<16x38xf32> -> vector<16x38xf32>
    %48 = arith.addf %45, %47 : vector<16x38xf32>
    %49 = vector.shape_cast %48 : vector<16x38xf32> to vector<2x8x38xf32>
    %cst_23 = arith.constant dense<0.000000e+00> : vector<2x38xf32>
    %50 = vector.multi_reduction <add>, %49, %cst_23 [1] : vector<2x8x38xf32> to vector<2x38xf32>
    %cst_24 = arith.constant 1.250000e-01 : f32
    %51 = vector.broadcast %cst_24 : f32 to vector<2x38xf32>
    %52 = arith.mulf %50, %51 : vector<2x38xf32>
    %53 = tpu.iota {dimensions = array<i32: 1>} : vector<2x38xi32>
    %c19_i32 = arith.constant 19 : i32
    %54 = vector.broadcast %c19_i32 : i32 to vector<2x38xi32>
    %55 = arith.cmpi sge, %53, %54 : vector<2x38xi32>
    %cst_25 = arith.constant 0.000000e+00 : f32
    %56 = vector.broadcast %cst_25 : f32 to vector<2x38xf32>
    %57 = arith.select %55, %52, %56 : vector<2x38xi1>, vector<2x38xf32>
    %c0_26 = arith.constant 0 : index
    %c0_27 = arith.constant 0 : index
    %58 = vector.load %arg8[%c0_26, %c0_27] : memref<1x38xf32, #tpu.memory_space<vmem>>, vector<1x38xf32>
    %59 = vector.broadcast %58 : vector<1x38xf32> to vector<2x38xf32>
    %60 = arith.subf %59, %57 : vector<2x38xf32>
    %61 = vector.shape_cast %60 : vector<2x38xf32> to vector<2x1x38xf32>
    %62 = vector.broadcast %61 : vector<2x1x38xf32> to vector<2x8x38xf32>
    %63 = arith.addf %49, %62 : vector<2x8x38xf32>
    %cst_28 = arith.constant 0.000000e+00 : f32
    %64 = vector.broadcast %cst_28 : f32 to vector<2x8x38xf32>
    %65 = arith.maximumf %63, %64 : vector<2x8x38xf32>
    %66 = vector.shape_cast %65 : vector<2x8x38xf32> to vector<16x38xf32>
    %c0_29 = arith.constant 0 : index
    %c0_30 = arith.constant 0 : index
    %67 = vector.load %arg9[%c0_29, %c0_30] : memref<38x32xbf16, #tpu.memory_space<vmem>>, vector<38x32xbf16>
    %68 = arith.truncf %66 : vector<16x38xf32> to vector<16x38xbf16>
    %cst_31 = arith.constant dense<0.000000e+00> : vector<16x32xf32>
    %69 = tpu.matmul %68, %67, %cst_31 {dimension_numbers = #tpu.dot_dimension_numbers<[1], [0], [0], [1], [0, 0, 1, 1], [], []>} : vector<16x38xbf16>, vector<38x32xbf16>, vector<16x32xf32> -> vector<16x32xf32>
    %c0_32 = arith.constant 0 : index
    %c0_33 = arith.constant 0 : index
    %70 = vector.load %arg10[%c0_32, %c0_33] : memref<1x32xf32, #tpu.memory_space<vmem>>, vector<1x32xf32>
    %71 = vector.broadcast %70 : vector<1x32xf32> to vector<16x32xf32>
    %72 = arith.addf %69, %71 : vector<16x32xf32>
    %73 = math.tanh %72 : vector<16x32xf32>
    %74 = vector.extract_strided_slice %73 {offsets = [0, 0], sizes = [16, 16], strides = [1, 1]} : vector<16x32xf32> to vector<16x16xf32>
    %75 = vector.extract_strided_slice %73 {offsets = [0, 16], sizes = [16, 16], strides = [1, 1]} : vector<16x32xf32> to vector<16x16xf32>
    %76 = arith.addf %74, %75 : vector<16x16xf32>
    %77 = arith.mulf %76, %76 : vector<16x16xf32>
    %cst_34 = arith.constant dense<0.000000e+00> : vector<16xf32>
    %78 = vector.multi_reduction <add>, %77, %cst_34 [1] : vector<16x16xf32> to vector<16xf32>
    %79 = vector.shape_cast %78 : vector<16xf32> to vector<16x1xf32>
    %80 = math.rsqrt %79 : vector<16x1xf32>
    %81 = vector.broadcast %80 : vector<16x1xf32> to vector<16x16xf32>
    %82 = arith.mulf %76, %81 : vector<16x16xf32>
    %83 = vector.shape_cast %82 : vector<16x16xf32> to vector<2x8x16xf32>
    %84 = vector.shape_cast %83 : vector<2x8x16xf32> to vector<16x16xf32>
    %85 = arith.truncf %84 : vector<16x16xf32> to vector<16x16xbf16>
    %c0_35 = arith.constant 0 : index
    %c0_36 = arith.constant 0 : index
    %86 = vector.load %arg11[%c0_35, %c0_36] : memref<16x48xbf16, #tpu.memory_space<vmem>>, vector<16x48xbf16>
    %cst_37 = arith.constant dense<0.000000e+00> : vector<16x48xf32>
    %87 = tpu.matmul %85, %86, %cst_37 {dimension_numbers = #tpu.dot_dimension_numbers<[1], [0], [0], [1], [0, 0, 1, 1], [], []>} : vector<16x16xbf16>, vector<16x48xbf16>, vector<16x48xf32> -> vector<16x48xf32>
    %c0_38 = arith.constant 0 : index
    %c0_39 = arith.constant 0 : index
    %88 = vector.load %arg12[%c0_38, %c0_39] : memref<6x48xbf16, #tpu.memory_space<vmem>>, vector<6x48xbf16>
    %cst_40 = arith.constant dense<0.000000e+00> : vector<16x48xf32>
    %89 = tpu.matmul %2, %88, %cst_40 {dimension_numbers = #tpu.dot_dimension_numbers<[1], [0], [0], [1], [0, 0, 1, 1], [], []>} : vector<16x6xbf16>, vector<6x48xbf16>, vector<16x48xf32> -> vector<16x48xf32>
    %90 = arith.addf %87, %89 : vector<16x48xf32>
    %c0_41 = arith.constant 0 : index
    %c0_42 = arith.constant 0 : index
    %91 = vector.load %arg13[%c0_41, %c0_42] : memref<1x48xf32, #tpu.memory_space<vmem>>, vector<1x48xf32>
    %92 = vector.broadcast %91 : vector<1x48xf32> to vector<16x48xf32>
    %93 = arith.addf %90, %92 : vector<16x48xf32>
    %94 = vector.shape_cast %93 : vector<16x48xf32> to vector<2x8x48xf32>
    %95 = vector.extract_strided_slice %94 {offsets = [0, 0, 0], sizes = [2, 8, 16], strides = [1, 1, 1]} : vector<2x8x48xf32> to vector<2x8x16xf32>
    %96 = vector.extract_strided_slice %94 {offsets = [0, 0, 16], sizes = [2, 8, 16], strides = [1, 1, 1]} : vector<2x8x48xf32> to vector<2x8x16xf32>
    %97 = vector.extract_strided_slice %94 {offsets = [0, 0, 32], sizes = [2, 8, 16], strides = [1, 1, 1]} : vector<2x8x48xf32> to vector<2x8x16xf32>
    %98 = arith.truncf %95 : vector<2x8x16xf32> to vector<2x8x16xbf16>
    %99 = arith.truncf %96 : vector<2x8x16xf32> to vector<2x8x16xbf16>
    "tpu.trace_start"() <{level = 10 : i32, message = "bnd,bmd->bnm"}> : () -> ()
    %cst_43 = arith.constant dense<0.000000e+00> : vector<2x8x8xf32>
    %100 = tpu.matmul %98, %99, %cst_43 {dimension_numbers = #tpu.dot_dimension_numbers<[2], [2], [1], [1], [0, 0, 0, 1, 1, 1], [0], [0]>} : vector<2x8x16xbf16>, vector<2x8x16xbf16>, vector<2x8x8xf32> -> vector<2x8x8xf32>
    "tpu.trace_stop"() : () -> ()
    %cst_44 = arith.constant dense<0xFF800000> : vector<2x8xf32>
    %101 = vector.multi_reduction <maximumf>, %100, %cst_44 [2] : vector<2x8x8xf32> to vector<2x8xf32>
    %102 = vector.shape_cast %101 : vector<2x8xf32> to vector<2x8x1xf32>
    %103 = vector.broadcast %102 : vector<2x8x1xf32> to vector<2x8x8xf32>
    %104 = arith.subf %100, %103 : vector<2x8x8xf32>
    %105 = math.exp %104 : vector<2x8x8xf32>
    %cst_45 = arith.constant dense<0.000000e+00> : vector<2x8xf32>
    %106 = vector.multi_reduction <add>, %105, %cst_45 [2] : vector<2x8x8xf32> to vector<2x8xf32>
    %107 = vector.shape_cast %106 : vector<2x8xf32> to vector<2x8x1xf32>
    %108 = tpu.reciprocal %107 {approx = true} : vector<2x8x1xf32> -> vector<2x8x1xf32>
    %109 = vector.broadcast %108 : vector<2x8x1xf32> to vector<2x8x8xf32>
    %110 = arith.mulf %105, %109 : vector<2x8x8xf32>
    %111 = arith.truncf %110 : vector<2x8x8xf32> to vector<2x8x8xbf16>
    %112 = arith.truncf %97 : vector<2x8x16xf32> to vector<2x8x16xbf16>
    "tpu.trace_start"() <{level = 10 : i32, message = "bnm,bmd->bnd"}> : () -> ()
    %cst_46 = arith.constant dense<0.000000e+00> : vector<2x8x16xf32>
    %113 = tpu.matmul %111, %112, %cst_46 {dimension_numbers = #tpu.dot_dimension_numbers<[2], [1], [1], [2], [0, 0, 0, 1, 1, 2], [0], [0]>} : vector<2x8x8xbf16>, vector<2x8x16xbf16>, vector<2x8x16xf32> -> vector<2x8x16xf32>
    "tpu.trace_stop"() : () -> ()
    %cst_47 = arith.constant dense<0.000000e+00> : vector<2x16xf32>
    %114 = vector.multi_reduction <add>, %113, %cst_47 [1] : vector<2x8x16xf32> to vector<2x16xf32>
    %c0_48 = arith.constant 0 : index
    %c0_49 = arith.constant 0 : index
    %115 = vector.load %arg14[%c0_48, %c0_49] : memref<16x16xbf16, #tpu.memory_space<vmem>>, vector<16x16xbf16>
    %116 = arith.truncf %114 : vector<2x16xf32> to vector<2x16xbf16>
    %cst_50 = arith.constant dense<0.000000e+00> : vector<2x16xf32>
    %117 = tpu.matmul %116, %115, %cst_50 {dimension_numbers = #tpu.dot_dimension_numbers<[1], [0], [0], [1], [0, 0, 1, 1], [], []>} : vector<2x16xbf16>, vector<16x16xbf16>, vector<2x16xf32> -> vector<2x16xf32>
    %c0_51 = arith.constant 0 : index
    %c0_52 = arith.constant 0 : index
    %118 = vector.load %arg15[%c0_51, %c0_52] : memref<1x16xf32, #tpu.memory_space<vmem>>, vector<1x16xf32>
    %cst_53 = arith.constant 8.000000e+00 : f32
    %119 = vector.broadcast %cst_53 : f32 to vector<1x16xf32>
    %120 = arith.mulf %119, %118 : vector<1x16xf32>
    %121 = vector.broadcast %120 : vector<1x16xf32> to vector<2x16xf32>
    %122 = arith.addf %117, %121 : vector<2x16xf32>
    %c0_54 = arith.constant 0 : index
    %c0_55 = arith.constant 0 : index
    %123 = vector.load %arg16[%c0_54, %c0_55] : memref<16x32xbf16, #tpu.memory_space<vmem>>, vector<16x32xbf16>
    %124 = arith.truncf %122 : vector<2x16xf32> to vector<2x16xbf16>
    %cst_56 = arith.constant dense<0.000000e+00> : vector<2x32xf32>
    %125 = tpu.matmul %124, %123, %cst_56 {dimension_numbers = #tpu.dot_dimension_numbers<[1], [0], [0], [1], [0, 0, 1, 1], [], []>} : vector<2x16xbf16>, vector<16x32xbf16>, vector<2x32xf32> -> vector<2x32xf32>
    %c0_57 = arith.constant 0 : index
    %c0_58 = arith.constant 0 : index
    %126 = vector.load %arg17[%c0_57, %c0_58] : memref<1x32xf32, #tpu.memory_space<vmem>>, vector<1x32xf32>
    %127 = vector.broadcast %126 : vector<1x32xf32> to vector<2x32xf32>
    %128 = arith.addf %125, %127 : vector<2x32xf32>
    %cst_59 = arith.constant 0.000000e+00 : f32
    %129 = vector.broadcast %cst_59 : f32 to vector<2x32xf32>
    %130 = arith.maximumf %128, %129 : vector<2x32xf32>
    %c0_60 = arith.constant 0 : index
    %c0_61 = arith.constant 0 : index
    %131 = vector.load %arg18[%c0_60, %c0_61] : memref<32x16xbf16, #tpu.memory_space<vmem>>, vector<32x16xbf16>
    %132 = arith.truncf %130 : vector<2x32xf32> to vector<2x32xbf16>
    %cst_62 = arith.constant dense<0.000000e+00> : vector<2x16xf32>
    %133 = tpu.matmul %132, %131, %cst_62 {dimension_numbers = #tpu.dot_dimension_numbers<[1], [0], [0], [1], [0, 0, 1, 1], [], []>} : vector<2x32xbf16>, vector<32x16xbf16>, vector<2x16xf32> -> vector<2x16xf32>
    %c0_63 = arith.constant 0 : index
    %c0_64 = arith.constant 0 : index
    %134 = vector.load %arg19[%c0_63, %c0_64] : memref<1x16xf32, #tpu.memory_space<vmem>>, vector<1x16xf32>
    %135 = vector.broadcast %134 : vector<1x16xf32> to vector<2x16xf32>
    %136 = arith.addf %133, %135 : vector<2x16xf32>
    %cst_65 = arith.constant 0.000000e+00 : f32
    %137 = vector.broadcast %cst_65 : f32 to vector<2x16xf32>
    %138 = arith.maximumf %136, %137 : vector<2x16xf32>
    %c0_66 = arith.constant 0 : index
    %c0_67 = arith.constant 0 : index
    %139 = vector.load %arg20[%c0_66, %c0_67] : memref<16x2xbf16, #tpu.memory_space<vmem>>, vector<16x2xbf16>
    %140 = arith.truncf %138 : vector<2x16xf32> to vector<2x16xbf16>
    %cst_68 = arith.constant dense<0.000000e+00> : vector<2x2xf32>
    %141 = tpu.matmul %140, %139, %cst_68 {dimension_numbers = #tpu.dot_dimension_numbers<[1], [0], [0], [1], [0, 0, 1, 1], [], []>} : vector<2x16xbf16>, vector<16x2xbf16>, vector<2x2xf32> -> vector<2x2xf32>
    %c0_69 = arith.constant 0 : index
    %c0_70 = arith.constant 0 : index
    %142 = vector.load %arg21[%c0_69, %c0_70] : memref<1x2xf32, #tpu.memory_space<vmem>>, vector<1x2xf32>
    %143 = vector.broadcast %142 : vector<1x2xf32> to vector<2x2xf32>
    %144 = arith.addf %141, %143 : vector<2x2xf32>
    %cst_71 = arith.constant dense<0xFF800000> : vector<2xf32>
    %145 = vector.multi_reduction <maximumf>, %144, %cst_71 [1] : vector<2x2xf32> to vector<2xf32>
    %146 = vector.shape_cast %145 : vector<2xf32> to vector<2x1xf32>
    %147 = vector.broadcast %146 : vector<2x1xf32> to vector<2x2xf32>
    %148 = arith.subf %144, %147 : vector<2x2xf32>
    %149 = math.exp %148 : vector<2x2xf32>
    %cst_72 = arith.constant dense<0.000000e+00> : vector<2xf32>
    %150 = vector.multi_reduction <add>, %149, %cst_72 [1] : vector<2x2xf32> to vector<2xf32>
    %151 = vector.shape_cast %150 : vector<2xf32> to vector<2x1xf32>
    %152 = vector.broadcast %151 : vector<2x1xf32> to vector<2x2xf32>
    %153 = arith.divf %149, %152 : vector<2x2xf32>
    %cst_73 = arith.constant 0.000000e+00 : f32
    %154 = vector.broadcast %cst_73 : f32 to vector<2x126xf32>
    %155 = tpu.concatenate %153, %154 in 1 : vector<2x2xf32>, vector<2x126xf32> -> vector<2x128xf32>
    %c0_74 = arith.constant 0 : index
    %c0_75 = arith.constant 0 : index
    %156 = vector.load %arg22[%c0_74, %c0_75] : memref<2x128xf32, #tpu.memory_space<vmem>>, vector<2x128xf32>
    tpu.vector_store %arg22[%c0_74, %c0_75], %155 {strides = array<i32>} : memref<2x128xf32, #tpu.memory_space<vmem>>, vector<2x128xf32>,
    return
  }
  func.func @transform_0(%arg0: i32) -> (i32, i32, i32) {
    %c0_i32 = arith.constant 0 : i32
    %c0_i32_0 = arith.constant 0 : i32
    %c0_i32_1 = arith.constant 0 : i32
    return %arg0, %c0_i32, %c0_i32_0 : i32, i32, i32
  }
  func.func @transform_1(%arg0: i32) -> (i32, i32) {
    %c0_i32 = arith.constant 0 : i32
    %c0_i32_0 = arith.constant 0 : i32
    %c0_i32_1 = arith.constant 0 : i32
    return %c0_i32, %c0_i32_0 : i32, i32
  }
  func.func @transform_2(%arg0: i32) -> (i32, i32) {
    %c0_i32 = arith.constant 0 : i32
    %c0_i32_0 = arith.constant 0 : i32
    %c0_i32_1 = arith.constant 0 : i32
    return %c0_i32, %c0_i32_0 : i32, i32
  }
  func.func @transform_3(%arg0: i32) -> (i32, i32) {
    %c0_i32 = arith.constant 0 : i32
    %c0_i32_0 = arith.constant 0 : i32
    %c0_i32_1 = arith.constant 0 : i32
    return %c0_i32, %c0_i32_0 : i32, i32
  }
  func.func @transform_4(%arg0: i32) -> (i32, i32) {
    %c0_i32 = arith.constant 0 : i32
    %c0_i32_0 = arith.constant 0 : i32
    %c0_i32_1 = arith.constant 0 : i32
    return %c0_i32, %c0_i32_0 : i32, i32
  }
  func.func @transform_5(%arg0: i32) -> (i32, i32) {
    %c0_i32 = arith.constant 0 : i32
    %c0_i32_0 = arith.constant 0 : i32
    %c0_i32_1 = arith.constant 0 : i32
    return %c0_i32, %c0_i32_0 : i32, i32
  }
  func.func @transform_6(%arg0: i32) -> (i32, i32) {
    %c0_i32 = arith.constant 0 : i32
    %c0_i32_0 = arith.constant 0 : i32
    %c0_i32_1 = arith.constant 0 : i32
    return %c0_i32, %c0_i32_0 : i32, i32
  }
  func.func @transform_7(%arg0: i32) -> (i32, i32) {
    %c0_i32 = arith.constant 0 : i32
    %c0_i32_0 = arith.constant 0 : i32
    %c0_i32_1 = arith.constant 0 : i32
    return %c0_i32, %c0_i32_0 : i32, i32
  }
  func.func @transform_8(%arg0: i32) -> (i32, i32) {
    %c0_i32 = arith.constant 0 : i32
    %c0_i32_0 = arith.constant 0 : i32
    %c0_i32_1 = arith.constant 0 : i32
    return %c0_i32, %c0_i32_0 : i32, i32
  }
  func.func @transform_9(%arg0: i32) -> (i32, i32) {
    %c0_i32 = arith.constant 0 : i32
    %c0_i32_0 = arith.constant 0 : i32
    %c0_i32_1 = arith.constant 0 : i32
    return %c0_i32, %c0_i32_0 : i32, i32
  }
  func.func @transform_10(%arg0: i32) -> (i32, i32) {
    %c0_i32 = arith.constant 0 : i32
    %c0_i32_0 = arith.constant 0 : i32
    %c0_i32_1 = arith.constant 0 : i32
    return %c0_i32, %c0_i32_0 : i32, i32
  }
  func.func @transform_11(%arg0: i32) -> (i32, i32) {
    %c0_i32 = arith.constant 0 : i32
    %c0_i32_0 = arith.constant 0 : i32
    %c0_i32_1 = arith.constant 0 : i32
    return %c0_i32, %c0_i32_0 : i32, i32
  }
  func.func @transform_12(%arg0: i32) -> (i32, i32) {
    %c0_i32 = arith.constant 0 : i32
    %c0_i32_0 = arith.constant 0 : i32
    %c0_i32_1 = arith.constant 0 : i32
    return %c0_i32, %c0_i32_0 : i32, i32
  }
  func.func @transform_13(%arg0: i32) -> (i32, i32) {
    %c0_i32 = arith.constant 0 : i32
    %c0_i32_0 = arith.constant 0 : i32
    %c0_i32_1 = arith.constant 0 : i32
    return %c0_i32, %c0_i32_0 : i32, i32
  }
  func.func @transform_14(%arg0: i32) -> (i32, i32) {
    %c0_i32 = arith.constant 0 : i32
    %c0_i32_0 = arith.constant 0 : i32
    %c0_i32_1 = arith.constant 0 : i32
    return %c0_i32, %c0_i32_0 : i32, i32
  }
  func.func @transform_15(%arg0: i32) -> (i32, i32) {
    %c0_i32 = arith.constant 0 : i32
    %c0_i32_0 = arith.constant 0 : i32
    %c0_i32_1 = arith.constant 0 : i32
    return %c0_i32, %c0_i32_0 : i32, i32
  }
  func.func @transform_16(%arg0: i32) -> (i32, i32) {
    %c0_i32 = arith.constant 0 : i32
    %c0_i32_0 = arith.constant 0 : i32
    %c0_i32_1 = arith.constant 0 : i32
    return %c0_i32, %c0_i32_0 : i32, i32
  }
  func.func @transform_17(%arg0: i32) -> (i32, i32) {
    %c0_i32 = arith.constant 0 : i32
    %c0_i32_0 = arith.constant 0 : i32
    %c0_i32_1 = arith.constant 0 : i32
    return %c0_i32, %c0_i32_0 : i32, i32
  }
  func.func @transform_18(%arg0: i32) -> (i32, i32) {
    %c0_i32 = arith.constant 0 : i32
    %c0_i32_0 = arith.constant 0 : i32
    %c0_i32_1 = arith.constant 0 : i32
    return %c0_i32, %c0_i32_0 : i32, i32
  }
  func.func @transform_19(%arg0: i32) -> (i32, i32) {
    %c0_i32 = arith.constant 0 : i32
    %c0_i32_0 = arith.constant 0 : i32
    %c0_i32_1 = arith.constant 0 : i32
    return %c0_i32, %c0_i32_0 : i32, i32
  }
  func.func @transform_20(%arg0: i32) -> (i32, i32) {
    %c0_i32 = arith.constant 0 : i32
    %c0_i32_0 = arith.constant 0 : i32
    %c0_i32_1 = arith.constant 0 : i32
    return %c0_i32, %c0_i32_0 : i32, i32
  }
  func.func @transform_21(%arg0: i32) -> (i32, i32) {
    %c0_i32 = arith.constant 0 : i32
    %c0_i32_0 = arith.constant 0 : i32
    return %arg0, %c0_i32 : i32, i32
  }
}

</mosaic_0001>

<bundles_post_ra>
// kernel: tpu_custom_call.1
= control target key start
LH: loop header
LB: loop body
LE: loop exit
PB: predicated region body
PF: predicated region fallthrough
CT: control target
= control target key end

     0   :  { %s1746_s0 = inlined_call_operand.vmem [shape: f32[2,8,6], index: 0, kind: input, shape index: {}]   ;;  %s1747_s1 = inlined_call_operand.vmem [shape: bf16[6,22], index: 1, kind: input, shape index: {}]   ;;  %s1748_s2 = inlined_call_operand.vmem [shape: f32[1,22], index: 2, kind: input, shape index: {}]   ;;  %s1749_s3 = inlined_call_operand.vmem [shape: bf16[22,32], index: 3, kind: input, shape index: {}]   ;;  %s1750_s4 = inlined_call_operand.vmem [shape: f32[1,32], index: 4, kind: input, shape index: {}]   ;;  %s1751_s5 = inlined_call_operand.vmem [shape: bf16[6,38], index: 5, kind: input, shape index: {}]   ;;  %s1752_s6 = inlined_call_operand.vmem [shape: bf16[16,38], index: 6, kind: input, shape index: {}]   ;;  %s1753_s7 = inlined_call_operand.vmem [shape: f32[1,38], index: 7, kind: input, shape index: {}]   ;;  %s1754_s8 = inlined_call_operand.vmem [shape: bf16[38,32], index: 8, kind: input, shape index: {}]   ;;  %s1755_s9 = inlined_call_operand.vmem [shape: f32[1,32], index: 9, kind: input, shape index: {}]   ;;  %s1756_s10 = inlined_call_operand.vmem [shape: bf16[16,48], index: 10, kind: input, shape index: {}]   ;;  %s1757_s11 = inlined_call_operand.vmem [shape: bf16[6,48], index: 11, kind: input, shape index: {}]   ;;  %s1758_s12 = inlined_call_operand.vmem [shape: f32[1,48], index: 12, kind: input, shape index: {}]   ;;  %s1759_s13 = inlined_call_operand.vmem [shape: bf16[16,16], index: 13, kind: input, shape index: {}]   ;;  %s1760_s14 = inlined_call_operand.vmem [shape: f32[1,16], index: 14, kind: input, shape index: {}]   ;;  %s1761_s15 = inlined_call_operand.vmem [shape: bf16[16,32], index: 15, kind: input, shape index: {}]   ;;  %s1762_s16 = inlined_call_operand.vmem [shape: f32[1,32], index: 16, kind: input, shape index: {}]   ;;  %s1763_s17 = inlined_call_operand.vmem [shape: bf16[32,16], index: 17, kind: input, shape index: {}]   ;;  %s1764_s18 = inlined_call_operand.vmem [shape: f32[1,16], index: 18, kind: input, shape index: {}]   ;;  %s1765_s19 = inlined_call_operand.vmem [shape: bf16[16,2], index: 19, kind: input, shape index: {}]   ;;  %s1766_s20 = inlined_call_operand.vmem [shape: f32[1,2], index: 20, kind: input, shape index: {}]   ;;  %s1767_s21 = inlined_call_operand.hbm [shape: f32[2,128], index: 21, kind: output, shape index: {}]  }
   0x1   :  { %1770 = sst [smem:[#allocation5_spill]] %s1746_s0 }
   0x2   :  { %1771 = sst [smem:[#allocation6_spill]] %s1747_s1 }
   0x3   :  { %1772 = sst [smem:[#allocation7_spill]] %s1748_s2 }
   0x4   :  { %1773 = sst [smem:[#allocation8_spill]] %s1749_s3 }
   0x5   :  { %1774 = sst [smem:[#allocation9_spill]] %s1750_s4 }
   0x6   :  { %1775 = sst [smem:[#allocation10_spill]] %s1751_s5 }
   0x7   :  { %s1776_s26 = sld [smem:[#allocation6_spill]]  ;;  %vm78_vm0 = vcmask 1042432   ;;  %s1777_s28 = sld [smem:[#allocation5_spill]]  ;;  %v1421_v2 = vmov 0.0   ;;  %vm1422_vm1 = vmmov 0   ;;  %vm74_vm2 = vcmask 48128  }
   0x8   :  { %1249 = vmatprep.subr.bf16.mxu0 %v1421_v2  ;;  %1251 = vmatprep.mubr.msk.bf16.mxu0 %vm1422_vm1, %v1421_v2 }
   0x9   :  { %1255 = vmatprep.subr.bf16.mxu1 %v1421_v2  ;;  %1259 = vmatprep.mubr.msk.bf16.mxu1 %vm1422_vm1, %v1421_v2 }
   0xd   :  { %v73_v0 = vld [vmem:[%s1776_s26] sm:$0x7]  ;;  %v71_v4 = vld [vmem:[%s1777_s28 + $0x8] sm:$0xff] }
   0xe   :  { %v70_v1 = vld [vmem:[%s1777_s28] sm:$0xff]  ;;  %v80_v3 = vsel %vm78_vm0, %v73_v0, 0 }
   0xf   :  { %1250 = vmatpush3.bf16.msra.mxu0 %v80_v3  ;;  %v1550_v5 = vpack.c.bf16 %v71_v4, %v70_v1 }
  0x10   :  { %1263 = vmatprep.subr.bf16.mxu0 %v1421_v2 }
  0x12   :  { %1252 = vmatmul.mubr.msk.bf16.vlgmr.msra.gmra.mrb[0].mxu0 %vm74_vm2, %v1550_v5 }
  0x13   :  { %1265 = vmatprep.mubr.msk.bf16.mxu0 %vm1422_vm1, %v1421_v2 }
  0x14   :  { %26 = vsyncpa [#allocation3], 0  ;;  %s1778_s5 = sld [smem:[#allocation8_spill]]  ;;  %vm123_vm3 = vcmask 179200   ;;  %v140_v22 = vlaneseq  ;;  %v1423_v25 = vmov 1966171168  }
  0x15   :  { %v159_v26 = vunpack.c.l.s4 %v1423_v25  ;;  %vm145_vm4 = vcmask 1041409   ;;  %s1779_s2 = sld [smem:[#allocation7_spill]]  ;;  %s1780_s27 = sld [smem:[#allocation9_spill]]  ;;  %vm275_vm6 = vcmask 130048   ;;  %vm386_vm7 = vcmask 310272  }
  0x16   :  { %v1571_v29 = vand.u32 127, %v140_v22  ;;  %v162_v32 = vshrl.u32 %v140_v22, 7  ;;  %s1424_s3 = smov 112   ;;  %s1781_s30 = sld [smem:[#allocation10_spill]]  ;;  %vm760_vm9 = vcmask 64512   ;;  %vm790_vm10 = vcmask 1043456  }
  0x17   :  { %v160_v31 = vunpack.c.0.s8 %v159_v26  ;;  %vm1047_vm11 = vcmask 261120   ;;  %vm1151_vm12 = vcmask 9216   ;;  %vm1163_vm13 = vcmask 15360  }
  0x18   :  { %vm142_vm5 = vcmp.ge.s32.totalorder %v1571_v29, 11  ;;  %v1581_v41 = vsub.s32 0, %v162_v32  ;;  %vm403_vm8 = vcmp.ge.s32.totalorder %v1571_v29, 19 }
  0x19   :  { %v1578_v37 = vsub.s32 %v160_v31, %v162_v32 }
  0x1a   :  { %v1357_v6 = vld [vmem:[%s1778_s5] sm:$0xff]   ;;  %v1358_v7 = vld [vmem:[%s1778_s5 + $0x8] ss:$0 sps:$4 sm:$0x77]  }
  0x1b   :  { %1256 = vmatpush3.bf16.msra.mxu1 %v1357_v6  ;;  %v218_v8 = vsel %vm78_vm0, %v1358_v7, 0  ;;  %v1181_v35 = vld [vmem:[%s1779_s2] ss:$0 sm:$0xff] }
  0x1c   :  { %1257 = vmatprep.subr.bf16.mxu1 %v1421_v2  ;;  %v1182_v52 = vld [vmem:[%s1780_s27] ss:$0 sm:$0xff] }
  0x1d   :  { %v1359_v7 = vld [vmem:[%s1752_s6] sm:$0xff]  }
  0x1e   :  { %1264 = vmatpush3.bf16.msra.mxu0 %v1359_v7 }
  0x1f   :  { %1258 = vmatpush3.bf16.msra.mxu1 %v218_v8  ;;  %1269 = vmatprep.subr.bf16.mxu0 %v1421_v2 }
  0x20   :  { %1275 = vmatprep.subr.bf16.mxu1 %v1421_v2 }
  0xe5   :  { %v116_v9 = vpop.f32.mrb[0].mxu0 }
  0xe6   :  { %v124_v10 = vsel %vm123_vm3, %v116_v9, 0.0  ;;  %v1253_v11 = vpop.f32.mrb[1].mxu0 }
  0xe7   :  { %v125_v12 = vrot.slane %v124_v10, 4  ;;  %v119_v13 = vpop.f32.mrb[2].mxu0 }
  0xe8   :  { %v131_v14 = vsel %vm123_vm3, %v119_v13, 0.0  ;;  %v1254_v15 = vpop.f32.mrb[3].mxu0 }
  0xe9   :  { %v126_v16 = vadd.f32 %v125_v12, %v124_v10  ;;  %v132_v17 = vrot.slane %v131_v14, 4 }
  0xeb   :  { %v127_v18 = vrot.slane %v126_v16, 2  ;;  %v133_v19 = vadd.f32 %v132_v17, %v131_v14  ;;  %v289_v14 = vld [vmem:[%s1781_s30] sm:$0x7] }
  0xed   :  { %v128_v20 = vadd.f32 %v127_v18, %v126_v16  ;;  %v134_v21 = vrot.slane %v133_v19, 2  ;;  %v343_v18 = vsel %vm78_vm0, %v289_v14, 0  ;;  %v556_v14 = vld [vmem:[%s1757_s11] sm:$0x7] }
  0xef   :  { %v129_v23 = vrot.slane %v128_v20, 1  ;;  %v135_v24 = vadd.f32 %v134_v21, %v133_v19  ;;  %v1360_v19 = vld [vmem:[%s1754_s8] sm:$0xff]   ;;  %v1362_v21 = vld [vmem:[%s1754_s8 + $0x10] ss:$0 sps:$4 sm:$0x77]  }
  0xf0   :  { %v486_v22 = vsel %vm78_vm0, %v1362_v21, 0 }
  0xf1   :  { %v130_v27 = vadd.f32 %v129_v23, %v128_v20  ;;  %v136_v28 = vrot.slane %v135_v24, 1  ;;  %v1361_v20 = vld [vmem:[%s1754_s8 + $0x8] sm:$0xff]  }
  0xf3   :  { %v137_v30 = vadd.f32 %v136_v28, %v135_v24  ;;  %v138_v33 = vmul.f32 0.125, %v130_v27 }
  0xf5   :  { %v139_v34 = vmul.f32 0.125, %v137_v30 }
  0xf7   :  { %v146_v36 = vsel %vm145_vm4, %v139_v34, %v138_v33 }
  0xf8   :  { %v148_v38 = vsel %vm142_vm5, %v146_v36, 0.0 }
  0xf9   :  { %v156_v39 = vsub.f32 %v1181_v35, %v148_v38 }
  0xfb   :  { %v164_v40 = vrot.slane %v156_v39, %v1578_v37 }
  0xfd   :  { %v165_v42 = vcombine.high %v164_v40, %v164_v40  ;;  %v172_v43 = vrot.slane %v164_v40, %v1578_v37 }
  0xff   :  { %v179_v44 = vrot.slane %v165_v42, %v1578_v37  ;;  %v183_v45 = vrot.slane %v172_v43, %v1581_v41 }
 0x101   :  { %v187_v46 = vrot.slane %v179_v44, %v1581_v41  ;;  %v190_v47 = vadd.f32 %v183_v45, %v116_v9 }
 0x103   :  { %v191_v48 = vadd.f32 %v187_v46, %v119_v13  ;;  %v192_v49 = vmax.f32 %v190_v47, 0.0  ;;  %v1189_v46 = vld [vmem:[%s1753_s7] ss:$0 sm:$0xff] }
 0x105   :  { %v193_v50 = vmax.f32 %v191_v48, 0.0 }
 0x107   :  { %v197_v51 = vpack.c.bf16 %v193_v50, %v192_v49 }
 0x109   :  { %1260 = vmatmul.mubr.msk.bf16.vlgmr.msra.gmra.mrb[0].mxu1 %vm123_vm3, %v197_v51 }
 0x10a   :  { %1281 = vmatprep.mubr.msk.bf16.mxu1 %vm1422_vm1, %v1421_v2  ;;  %1276 = vmatpush3.bf16.msra.mxu1 %v1360_v19 }
 0x10b   :  { %1277 = vmatprep.subr.bf16.mxu1 %v1421_v2 }
 0x10e   :  { %1278 = vmatpush3.bf16.msra.mxu1 %v1361_v20 }
 0x10f   :  { %1279 = vmatprep.subr.bf16.mxu1 %v1421_v2 }
 0x112   :  { %1280 = vmatpush3.bf16.msra.mxu1 %v486_v22 }
 0x113   :  { %1291 = vmatprep.subr.bf16.mxu1 %v1421_v2 }
 0x1dc   :  { %v254_v53 = vpop.f32.mrb[0].mxu1 }
 0x1dd   :  { %v255_v54 = vadd.f32 %v1182_v52, %v254_v53  ;;  %v1261_v55 = vpop.f32.mrb[1].mxu1 }
 0x1de   :  { %v257_v56 = vpop.f32.mrb[2].mxu1 }
 0x1df   :  { %1369 = vtanh.f32 %v255_v54  ;;  %v258_v57 = vadd.f32 %v1182_v52, %v257_v56  ;;  %v1262_v58 = vpop.f32.mrb[3].mxu1 }
 0x1e1   :  { %1371 = vtanh.f32 %v258_v57 }
 0x1e9   :  { %v1370_v59 = vpop.eup %1369 }
 0x1ea   :  { %265 = vrot.lane.b32.xlu0 %v1370_v59, %s1424_s3 }
 0x1eb   :  { %v1372_v60 = vpop.eup %1371 }
 0x1ee   :  { %267 = vrot.lane.b32.xlu0 %v1372_v60, %s1424_s3 }
 0x25c   :  { %v266_v61 = vpop.permute.xlu0 %265 }
 0x25d   :  { %v271_v62 = vadd.f32 %v1370_v59, %v266_v61 }
 0x25f   :  { %v273_v63 = vmul.f32 %v271_v62, %v271_v62 }
 0x260   :  { %v268_v0 = vpop.permute.xlu0 %267 }
 0x261   :  { %v272_v1 = vadd.f32 %v1372_v60, %v268_v0  ;;  %v276_v3 = vsel %vm275_vm6, %v273_v63, 0.0  ;;  %v1190_v60 = vld [vmem:[%s1755_s9] ss:$0 sm:$0xff] }
 0x262   :  { %277 = vadd.xlane.f32.xlu1 %v276_v3 }
 0x263   :  { %v274_v4 = vmul.f32 %v272_v1, %v272_v1 }
 0x265   :  { %v279_v6 = vsel %vm275_vm6, %v274_v4, 0.0 }
 0x266   :  { %280 = vadd.xlane.f32.xlu1 %v279_v6 }
 0x2ef   :  { %v278_v8 = vpop.xlane.xlu1 %277 }
 0x2f0   :  { %1373 = vrsqrt.f32 %v278_v8 }
 0x2f3   :  { %v281_v9 = vpop.xlane.xlu1 %280 }
 0x2f4   :  { %1375 = vrsqrt.f32 %v281_v9 }
 0x2fa   :  { %v1374_v10 = vpop.eup %1373 }
 0x2fb   :  { %v284_v11 = vmul.f32 %v1374_v10, %v271_v62 }
 0x2fd   :  { %v286_v15 = vmax.f32 %v284_v11, 0.0 }
 0x2fe   :  { %v1376_v12 = vpop.eup %1375 }
 0x2ff   :  { %v285_v13 = vmul.f32 %v1376_v12, %v272_v1 }
 0x301   :  { %v287_v16 = vmax.f32 %v285_v13, 0.0 }
 0x303   :  { %v288_v17 = vpack.c.bf16 %v287_v16, %v286_v15  ;;  %v558_v15 = vsel %vm78_vm0, %v556_v14, 0  ;;  %v1363_v16 = vld [vmem:[%s1756_s10] sm:$0xff]  }
 0x304   :  { %v1365_v14 = vld [vmem:[%s1761_s15] sm:$0xff]  }
 0x305   :  { %1266 = vmatmul.mubr.msk.bf16.vlgmr.msra.gmra.mrb[4].mxu0 %vm275_vm6, %v288_v17 }
 0x306   :  { %1270 = vmatpush3.bf16.msra.mxu0 %v343_v18  ;;  %1271 = vmatprep.mubr.msk.bf16.mxu0 %vm1422_vm1, %v1421_v2 }
 0x307   :  { %1285 = vmatprep.subr.bf16.mxu0 %v1421_v2 }
 0x311   :  { %1272 = vmatmul.mubr.msk.bf16.vlgmr.msra.gmra.mrb[4].mxu0 %vm74_vm2, %v1550_v5 }
 0x312   :  { %1287 = vmatprep.mubr.msk.bf16.mxu0 %vm1422_vm1, %v1421_v2  ;;  %1286 = vmatpush3.bf16.msra.mxu0 %v558_v15 }
 0x313   :  { %1297 = vmatprep.subr.bf16.mxu0 %v1421_v2 }
 0x319   :  { %1288 = vmatmul.mubr.msk.bf16.vlgmr.msra.gmra.mrb[8].mxu0 %vm74_vm2, %v1550_v5 }
 0x31a   :  { %1299 = vmatprep.mubr.msk.bf16.mxu0 %vm1422_vm1, %v1421_v2 }
 0x3e4   :  { %v379_v23 = vpop.f32.mrb[4].mxu0 }
 0x3e5   :  { %v387_v24 = vsel %vm386_vm7, %v379_v23, 0.0  ;;  %v1273_v25 = vpop.f32.mrb[5].mxu0 }
 0x3e6   :  { %v388_v26 = vrot.slane %v387_v24, 4  ;;  %v382_v27 = vpop.f32.mrb[6].mxu0 }
 0x3e7   :  { %v394_v28 = vsel %vm386_vm7, %v382_v27, 0.0  ;;  %v1274_v30 = vpop.f32.mrb[7].mxu0 }
 0x3e8   :  { %v389_v31 = vadd.f32 %v388_v26, %v387_v24  ;;  %v395_v32 = vrot.slane %v394_v28, 4 }
 0x3ea   :  { %v390_v33 = vrot.slane %v389_v31, 2  ;;  %v396_v34 = vadd.f32 %v395_v32, %v394_v28  ;;  %v1198_v28 = vld [vmem:[%s1758_s12] ss:$0 sm:$0xff]  ;;  %s1425_s12 = smov 96  }
 0x3ec   :  { %v391_v35 = vadd.f32 %v390_v33, %v389_v31  ;;  %v397_v36 = vrot.slane %v396_v34, 2  ;;  %v594_v5 = vpop.f32.mrb[8].mxu0 }
 0x3ed   :  { %v1289_v24 = vpop.f32.mrb[9].mxu0 }
 0x3ee   :  { %v392_v38 = vrot.slane %v391_v35, 1  ;;  %v398_v39 = vadd.f32 %v397_v36, %v396_v34  ;;  %v597_v25 = vpop.f32.mrb[10].mxu0 }
 0x3ef   :  { %v1290_v26 = vpop.f32.mrb[11].mxu0 }
 0x3f0   :  { %v393_v40 = vadd.f32 %v392_v38, %v391_v35  ;;  %v399_v42 = vrot.slane %v398_v39, 1 }
 0x3f2   :  { %v400_v43 = vadd.f32 %v399_v42, %v398_v39  ;;  %v401_v44 = vmul.f32 0.125, %v393_v40 }
 0x3f4   :  { %v402_v45 = vmul.f32 0.125, %v400_v43 }
 0x3f6   :  { %v406_v47 = vsel %vm145_vm4, %v402_v45, %v401_v44 }
 0x3f7   :  { %v408_v48 = vsel %vm403_vm8, %v406_v47, 0.0 }
 0x3f8   :  { %v416_v49 = vsub.f32 %v1189_v46, %v408_v48 }
 0x3fa   :  { %v424_v50 = vrot.slane %v416_v49, %v1578_v37 }
 0x3fc   :  { %v425_v51 = vcombine.high %v424_v50, %v424_v50  ;;  %v432_v52 = vrot.slane %v424_v50, %v1578_v37 }
 0x3fe   :  { %v439_v53 = vrot.slane %v425_v51, %v1578_v37  ;;  %v443_v54 = vrot.slane %v432_v52, %v1581_v41 }
 0x400   :  { %v447_v55 = vrot.slane %v439_v53, %v1581_v41  ;;  %v450_v29 = vadd.f32 %v443_v54, %v379_v23 }
 0x402   :  { %v451_v56 = vadd.f32 %v447_v55, %v382_v27  ;;  %v452_v57 = vmax.f32 %v450_v29, 0.0 }
 0x404   :  { %v453_v58 = vmax.f32 %v451_v56, 0.0 }
 0x406   :  { %v459_v59 = vpack.c.bf16 %v453_v58, %v452_v57 }
 0x408   :  { %1282 = vmatmul.mubr.msk.bf16.vlgmr.msra.gmra.mrb[4].mxu1 %vm386_vm7, %v459_v59 }
 0x409   :  { %1293 = vmatprep.mubr.msk.bf16.mxu1 %vm1422_vm1, %v1421_v2  ;;  %1292 = vmatpush3.bf16.msra.mxu1 %v1363_v16 }
 0x40a   :  { %1303 = vmatprep.subr.bf16.mxu1 %v1421_v2 }
 0x4db   :  { %v522_v61 = vpop.f32.mrb[4].mxu1 }
 0x4dc   :  { %v523_v37 = vadd.f32 %v1190_v60, %v522_v61  ;;  %v1283_v62 = vpop.f32.mrb[5].mxu1 }
 0x4dd   :  { %v525_v63 = vpop.f32.mrb[6].mxu1 }
 0x4de   :  { %1377 = vtanh.f32 %v523_v37  ;;  %v526_v0 = vadd.f32 %v1190_v60, %v525_v63  ;;  %v1284_v1 = vpop.f32.mrb[7].mxu1 }
 0x4e0   :  { %1379 = vtanh.f32 %v526_v0 }
 0x4e8   :  { %v1378_v3 = vpop.eup %1377 }
 0x4e9   :  { %533 = vrot.lane.b32.xlu0 %v1378_v3, %s1424_s3 }
 0x4ea   :  { %v1380_v4 = vpop.eup %1379 }
 0x4eb   :  { %535 = vrot.lane.b32.xlu1 %v1380_v4, %s1424_s3 }
 0x55b   :  { %v534_v6 = vpop.permute.xlu0 %533 }
 0x55c   :  { %v539_v7 = vadd.f32 %v1378_v3, %v534_v6 }
 0x55d   :  { %v536_v8 = vpop.permute.xlu1 %535 }
 0x55e   :  { %v540_v9 = vadd.f32 %v1380_v4, %v536_v8  ;;  %v541_v10 = vmul.f32 %v539_v7, %v539_v7 }
 0x560   :  { %v543_v11 = vsel %vm275_vm6, %v541_v10, 0.0  ;;  %v542_v12 = vmul.f32 %v540_v9, %v540_v9 }
 0x561   :  { %544 = vadd.xlane.f32.xlu0 %v543_v11 }
 0x562   :  { %v546_v13 = vsel %vm275_vm6, %v542_v12, 0.0 }
 0x563   :  { %547 = vadd.xlane.f32.xlu1 %v546_v13  ;;  %v1364_v13 = vld [vmem:[%s1759_s13] sm:$0xff]  }
 0x5ee   :  { %v545_v17 = vpop.xlane.xlu0 %544 }
 0x5ef   :  { %1381 = vrsqrt.f32 %v545_v17 }
 0x5f0   :  { %v548_v18 = vpop.xlane.xlu1 %547 }
 0x5f1   :  { %1383 = vrsqrt.f32 %v548_v18 }
 0x5f9   :  { %v1382_v19 = vpop.eup %1381 }
 0x5fa   :  { %v551_v21 = vmul.f32 %v1382_v19, %v539_v7 }
 0x5fb   :  { %v1384_v20 = vpop.eup %1383 }
 0x5fc   :  { %v552_v22 = vmul.f32 %v1384_v20, %v540_v9 }
 0x5fe   :  { %v553_v23 = vpack.c.bf16 %v552_v22, %v551_v21 }
 0x600   :  { %1294 = vmatmul.mubr.msk.bf16.vlgmr.msra.gmra.mrb[8].mxu1 %vm275_vm6, %v553_v23 }
 0x601   :  { %1305 = vmatprep.mubr.msk.bf16.mxu1 %vm1422_vm1, %v1421_v2 }
 0x6d3   :  { %v644_v27 = vpop.f32.mrb[8].mxu1 }
 0x6d4   :  { %v645_v30 = vadd.f32 %v644_v27, %v594_v5  ;;  %v1295_v31 = vpop.f32.mrb[9].mxu1 }
 0x6d5   :  { %v647_v32 = vpop.f32.mrb[10].mxu1 }
 0x6d6   :  { %v658_v33 = vadd.f32 %v1198_v28, %v645_v30  ;;  %v648_v34 = vadd.f32 %v647_v32, %v597_v25  ;;  %v1296_v35 = vpop.f32.mrb[11].mxu1 }
 0x6d8   :  { %v660_v36 = vpack.c.bf16 %v658_v33, %v658_v33  ;;  %v659_v38 = vadd.f32 %v1198_v28, %v648_v34 }
 0x6da   :  { %v661_v39 = vpack.c.bf16 %v659_v38, %v659_v38  ;;  %663 = vrot.lane.b32.xlu0 %v660_v36, %s1424_s3 }
 0x6dc   :  { %712 = vrot.lane.b32.xlu1 %v661_v39, %s1424_s3 }
 0x74c   :  { %v664_v40 = vpop.permute.xlu0 %663 }
 0x74d   :  { %v669_v42 = vsel %vm275_vm6, %v664_v40, 0 }
 0x74e   :  { %1298 = vmatpush3.bf16.xpose.msra.mxu0 %v669_v42  ;;  %v713_v43 = vpop.permute.xlu1 %712 }
 0x74f   :  { %v718_v44 = vsel %vm275_vm6, %v713_v43, 0  ;;  %1309 = vmatprep.subr.bf16.mxu0 %v1421_v2 }
 0x750   :  { %1304 = vmatpush3.bf16.xpose.msra.mxu1 %v718_v44 }
 0x751   :  { %1315 = vmatprep.subr.bf16.mxu1 %v1421_v2 }
 0x755   :  { %1300 = vmatmul.mubr.msk.bf16.vlgmr.msra.gmra.mrb[12].mxu0 %vm275_vm6, %v660_v36 }
 0x756   :  { %1311 = vmatprep.mubr.msk.bf16.mxu0 %vm1422_vm1, %v1421_v2 }
 0x757   :  { %1306 = vmatmul.mubr.msk.bf16.vlgmr.msra.gmra.mrb[12].mxu1 %vm275_vm6, %v661_v39 }
 0x758   :  { %1317 = vmatprep.mubr.msk.bf16.mxu1 %vm1422_vm1, %v1421_v2 }
 0x828   :  { %v705_v45 = vpop.f32.mrb[12].mxu0 }
 0x829   :  { %v1301_v46 = vpop.f32.mrb[13].mxu0  ;;  %v761_v47 = vsel %vm760_vm9, %v705_v45, -inf }
 0x82a   :  { %v754_v48 = vpop.f32.mrb[12].mxu1  ;;  %762 = vmax.xlane.f32.xlu0 %v761_v47  ;;  %v708_v49 = vpop.f32.mrb[14].mxu0 }
 0x82b   :  { %v1302_v50 = vpop.f32.mrb[15].mxu0  ;;  %v1307_v51 = vpop.f32.mrb[13].mxu1  ;;  %v764_v52 = vsel %vm760_vm9, %v754_v48, -inf }
 0x82c   :  { %765 = vmax.xlane.f32.xlu1 %v764_v52  ;;  %v757_v53 = vpop.f32.mrb[14].mxu1 }
 0x82d   :  { %v1308_v54 = vpop.f32.mrb[15].mxu1 }
 0x82e   :  { %v1366_v54 = vld [vmem:[%s1763_s17] sm:$0xff]  }
 0x83d   :  { %834 = vrot.lane.b32.xlu1 %v661_v39, %s1425_s12 }
 0x8b7   :  { %v763_v55 = vpop.xlane.xlu0 %762 }
 0x8b8   :  { %v767_v29 = vsub.f32 %v705_v45, %v763_v55  ;;  %v900_v45 = vld [vmem:[%s1760_s14] sm:$0x1] }
 0x8b9   :  { %v766_v56 = vpop.xlane.xlu1 %765  ;;  %v901_v46 = vmul.f32 8.0, %v900_v45  ;;  %v1205_v55 = vld [vmem:[%s1762_s16] ss:$0 sm:$0xff] }
 0x8ba   :  { %v769_v57 = vmul.f32 1.442695, %v767_v29  ;;  %v768_v58 = vsub.f32 %v754_v48, %v766_v56 }
 0x8bb   :  { %v906_v47 = vrot.slane %v901_v46, %v1581_v41  ;;  %v1367_v41 = vld [vmem:[%s1763_s17 + $0x8] sm:$0xff]  }
 0x8bc   :  { %1385 = vpow2.f32 %v769_v57  ;;  %v771_v59 = vmul.f32 1.442695, %v768_v58 }
 0x8bd   :  { %v835_v60 = vpop.permute.xlu1 %834 }
 0x8be   :  { %1387 = vpow2.f32 %v771_v59  ;;  %v840_v61 = vsel %vm790_vm10, %v835_v60, 0 }
 0x8bf   :  { %1316 = vmatpush3.bf16.msra.mxu1 %v840_v61 }
 0x8c0   :  { %1327 = vmatprep.subr.bf16.mxu1 %v1421_v2 }
 0x8c6   :  { %v1386_v37 = vpop.eup %1385 }
 0x8c7   :  { %v773_v62 = vsel %vm760_vm9, %v1386_v37, 0.0 }
 0x8c8   :  { %v1388_v63 = vpop.eup %1387  ;;  %774 = vadd.xlane.f32.xlu0 %v773_v62 }
 0x8c9   :  { %v776_v0 = vsel %vm760_vm9, %v1388_v63, 0.0 }
 0x8cc   :  { %777 = vadd.xlane.f32.xlu0 %v776_v0 }
 0x8e2   :  { %785 = vrot.lane.b32.xlu0 %v660_v36, %s1425_s12 }
 0x955   :  { %v775_v1 = vpop.xlane.xlu0 %774 }
 0x956   :  { %1389 = vrcp.f32 %v775_v1 }
 0x959   :  { %v778_v3 = vpop.xlane.xlu0 %777 }
 0x95a   :  { %1391 = vrcp.f32 %v778_v3 }
 0x95d   :  { %v786_v4 = vpop.permute.xlu0 %785 }
 0x95e   :  { %v792_v6 = vsel %vm790_vm10, %v786_v4, 0 }
 0x95f   :  { %1310 = vmatpush3.bf16.msra.mxu0 %v792_v6 }
 0x960   :  { %v1390_v7 = vpop.eup %1389  ;;  %1321 = vmatprep.subr.bf16.mxu0 %v1421_v2 }
 0x961   :  { %v781_v8 = vmul.f32 %v1390_v7, %v1386_v37  ;;  %v1208_v37 = vld [vmem:[%s1764_s18] ss:$0 sm:$0xff]  ;;  %s1426_s18 = smov [#allocation2]  }
 0x962   :  { %v1212_v7 = vld [vmem:[%s1766_s20] ss:$0 sm:$0xff] }
 0x963   :  { %v783_v9 = vpack.c.bf16 %v781_v8, %v781_v8 }
 0x964   :  { %v1392_v10 = vpop.eup %1391 }
 0x965   :  { %v782_v11 = vmul.f32 %v1392_v10, %v1388_v63  ;;  %1312 = vmatmul.mubr.msk.bf16.vlgmr.msra.gmra.mrb[16].mxu0 %vm760_vm9, %v783_v9 }
 0x966   :  { %1323 = vmatprep.mubr.msk.bf16.mxu0 %vm1422_vm1, %v1421_v2  ;;  %1322 = vmatpush3.bf16.msra.mxu0 %v1364_v13 }
 0x967   :  { %v784_v12 = vpack.c.bf16 %v782_v11, %v782_v11  ;;  %1333 = vmatprep.subr.bf16.mxu0 %v1421_v2 }
 0x969   :  { %1318 = vmatmul.mubr.msk.bf16.vlgmr.msra.gmra.mrb[16].mxu1 %vm760_vm9, %v784_v12 }
 0x96a   :  { %1329 = vmatprep.mubr.msk.bf16.mxu1 %vm1422_vm1, %v1421_v2  ;;  %1328 = vmatpush3.bf16.msra.mxu1 %v1365_v14 }
 0x96b   :  { %1341 = vmatprep.subr.bf16.mxu1 %v1421_v2 }
 0xa38   :  { %v828_v15 = vpop.f32.mrb[16].mxu0 }
 0xa39   :  { %v882_v16 = vsel %vm275_vm6, %v828_v15, 0.0  ;;  %v1313_v17 = vpop.f32.mrb[17].mxu0 }
 0xa3a   :  { %v883_v18 = vrot.slane %v882_v16, 4  ;;  %v831_v19 = vpop.f32.mrb[18].mxu0 }
 0xa3b   :  { %v1314_v20 = vpop.f32.mrb[19].mxu0 }
 0xa3c   :  { %v884_v21 = vadd.f32 %v883_v18, %v882_v16  ;;  %v876_v22 = vpop.f32.mrb[16].mxu1 }
 0xa3d   :  { %v889_v23 = vsel %vm275_vm6, %v876_v22, 0.0  ;;  %v1319_v5 = vpop.f32.mrb[17].mxu1 }
 0xa3e   :  { %v885_v24 = vrot.slane %v884_v21, 2  ;;  %v890_v25 = vrot.slane %v889_v23, 4  ;;  %v879_v26 = vpop.f32.mrb[18].mxu1 }
 0xa3f   :  { %v1320_v27 = vpop.f32.mrb[19].mxu1 }
 0xa40   :  { %v886_v28 = vadd.f32 %v885_v24, %v884_v21  ;;  %v891_v30 = vadd.f32 %v890_v25, %v889_v23 }
 0xa42   :  { %v887_v31 = vrot.slane %v886_v28, 1  ;;  %v892_v32 = vrot.slane %v891_v30, 2 }
 0xa44   :  { %v888_v33 = vadd.f32 %v887_v31, %v886_v28  ;;  %v893_v34 = vadd.f32 %v892_v32, %v891_v30 }
 0xa46   :  { %v894_v35 = vrot.slane %v893_v34, 1  ;;  %v898_v36 = vpack.c.bf16 %v888_v33, %v888_v33 }
 0xa48   :  { %v895_v38 = vadd.f32 %v894_v35, %v893_v34  ;;  %v910_v40 = vunpack.c.l.b16 %v898_v36 }
 0xa4a   :  { %v899_v39 = vpack.c.bf16 %v895_v38, %v895_v38 }
 0xa4c   :  { %v911_v42 = vunpack.c.l.b16 %v899_v39 }
 0xa4e   :  { %v912_v43 = vsel %vm145_vm4, %v911_v42, %v910_v40 }
 0xa4f   :  { %v913_v44 = vpack.c.b16 %v912_v43, %v912_v43 }
 0xa51   :  { %1324 = vmatmul.mubr.msk.bf16.vlgmr.msra.gmra.mrb[20].mxu0 %vm275_vm6, %v913_v44 }
 0xa52   :  { %1337 = vmatprep.mubr.msk.bf16.mxu0 %vm1422_vm1, %v1421_v2  ;;  %1334 = vmatpush3.bf16.msra.mxu0 %v1366_v54 }
 0xa53   :  { %1335 = vmatprep.subr.bf16.mxu0 %v1421_v2 }
 0xa56   :  { %1336 = vmatpush3.bf16.msra.mxu0 %v1367_v41 }
 0xb24   :  { %v957_v48 = vpop.f32.mrb[20].mxu0 }
 0xb25   :  { %v958_v49 = vadd.f32 %v957_v48, %v906_v47  ;;  %v1325_v50 = vpop.f32.mrb[21].mxu0 }
 0xb26   :  { %v960_v51 = vpop.f32.mrb[22].mxu0 }
 0xb27   :  { %v965_v52 = vpack.c.bf16 %v958_v49, %v958_v49  ;;  %v1326_v53 = vpop.f32.mrb[23].mxu0 }
 0xb29   :  { %1330 = vmatmul.mubr.msk.bf16.vlgmr.msra.gmra.mrb[20].mxu1 %vm275_vm6, %v965_v52 }
 0xb2a   :  { %1343 = vmatprep.mubr.msk.bf16.mxu1 %vm1422_vm1, %v1421_v2  ;;  %v1368_v2 = vld [vmem:[%s1765_s19] sm:$0xff]   ;;  %s1172_s19 = sshll.u32 %s1426_s18, 4  ;;  %s1173_s19 = int_to_ptr.vmem [resolvable:$true] %s1172_s19 }
 0xb2b   :  { %1342 = vmatpush3.bf16.msra.mxu1 %v1368_v2  ;;  %s1397_s20 = scalar_lea.vmem %s1173_s19, 32  ;;  %p1402_p1 = scmp.lt.s32.totalorder %s1173_s19, %s1173_s19 }
 0xb2c   :  { %p1398_p0 = scmp.ne.s32.totalorder %s1173_s19, %s1397_s20  ;;  %p1403_p2 = scmp.lt.s32.totalorder %s1397_s20, %s1397_s20 }
 0xb2e   :  { %p1404_p3 = por %p1403_p2, %p1402_p1 }
 0xb30   :  { %p1405_p4 = pnand %p1404_p3, %p1398_p0 }
 0xbfc   :  { %v1016_v29 = vpop.f32.mrb[20].mxu1 }
 0xbfd   :  { %v1017_v56 = vadd.f32 %v1205_v55, %v1016_v29  ;;  %v1331_v57 = vpop.f32.mrb[21].mxu1 }
 0xbfe   :  { %v1019_v58 = vpop.f32.mrb[22].mxu1 }
 0xbff   :  { %v1022_v59 = vmax.f32 %v1017_v56, 0.0  ;;  %v1332_v60 = vpop.f32.mrb[23].mxu1 }
 0xc01   :  { %v1027_v61 = vpack.c.bf16 %v1022_v59, %v1022_v59 }
 0xc03   :  { %1338 = vmatmul.mubr.msk.bf16.vlgmr.msra.gmra.mrb[24].mxu0 %vm1047_vm11, %v1027_v61 }
 0xcd6   :  { %v1085_v62 = vpop.f32.mrb[24].mxu0 }
 0xcd7   :  { %v1086_v63 = vadd.f32 %v1208_v37, %v1085_v62  ;;  %v1339_v0 = vpop.f32.mrb[25].mxu0 }
 0xcd8   :  { %v1088_v1 = vpop.f32.mrb[26].mxu0 }
 0xcd9   :  { %v1091_v3 = vmax.f32 %v1086_v63, 0.0  ;;  %v1340_v4 = vpop.f32.mrb[27].mxu0 }
 0xcdb   :  { %v1094_v6 = vpack.c.bf16 %v1091_v3, %v1091_v3 }
 0xcdd   :  { %1344 = vmatmul.mubr.msk.bf16.vlgmr.msra.gmra.mrb[24].mxu1 %vm275_vm6, %v1094_v6 }
 0xdb0   :  { %v1145_v8 = vpop.f32.mrb[24].mxu1 }
 0xdb1   :  { %v1146_v9 = vadd.f32 %v1212_v7, %v1145_v8  ;;  %v1345_v10 = vpop.f32.mrb[25].mxu1 }
 0xdb2   :  { %v1148_v11 = vpop.f32.mrb[26].mxu1 }
 0xdb3   :  { %v1346_v12 = vpop.f32.mrb[27].mxu1  ;;  %v1152_v13 = vsel %vm1151_vm12, %v1146_v9, -inf }
 0xdb4   :  { %1153 = vmax.xlane.f32.xlu0 %v1152_v13 }
 0xe41   :  { %v1154_v14 = vpop.xlane.xlu0 %1153 }
 0xe42   :  { %v1155_v15 = vsub.f32 %v1146_v9, %v1154_v14 }
 0xe44   :  { %v1156_v16 = vmul.f32 1.442695, %v1155_v15 }
 0xe46   :  { %1393 = vpow2.f32 %v1156_v16 }
 0xe50   :  { %v1394_v17 = vpop.eup %1393 }
 0xe51   :  { %v1158_v18 = vsel %vm1151_vm12, %v1394_v17, 0.0 }
 0xe52   :  { %1159 = vadd.xlane.f32.xlu1 %v1158_v18 }
 0xedf   :  { %v1160_v19 = vpop.xlane.xlu1 %1159 }
 0xee0   :  { %1395 = vrcp.f32 %v1160_v19 }
 0xeea   :  { %v1396_v20 = vpop.eup %1395 }
 0xeeb   :  { %v1162_v21 = vmul.f32 %v1396_v20, %v1394_v17 }
 0xeed   :  { %v1164_v22 = vsel %vm1163_vm13, %v1162_v21, 0.0 }
 0xeee   :  { %1165 = vst [vmem:[#allocation2] sm:$0x3] %v1164_v22 }
 0xeef   :  { %1408 = shalt.err (!%p1405_p4)
}
 0xef0   :  { %s1409_s9 = scalar_lea.hbm %s1767_s21, 32 }
 0xef1   :  { %p1410_p5 = scmp.ne.s32.totalorder %s1767_s21, %s1409_s9  ;;  %p1413_p6 = scmp.lt.u32.totalorder %s1409_s9, %s1767_s21 }
 0xef3   :  { %p1415_p7 = pnand %p1413_p6, %p1410_p5 }
 0xef5   :  { %1418 = shalt.err (!%p1415_p7)
}
 0xef6   :  { %1175 = dma.vmem_to_hbm [thread:$0]  %s1173_s19, 32, %s1767_s21, [#allocation3]  }
 0xef7   :  { %1419 = dma.done.wait [#allocation3], 32  }
 0xef8   :  { %1420 = vsyncadd [#allocation3], 4294967264 }
 0xef9   :  { %1179 = vsyncpa [#allocation3], 1 }

</bundles_post_ra>
